<compile_context>
chip_gen: v7x
topology: tpu7x:2x2x1
jax: 0.10.0
libtpu: 0.0.40
codegen_flags: <defaults>
</compile_context>

<pallas_src>
import functools

import jax
import jax.numpy as jnp
from jax.experimental import pallas as pl
from jax.experimental.pallas import tpu as pltpu

_PAIRWISE_EPS = 1e-6  # nn.PairwiseDistance default eps


def _round_up(x, m):
    return (x + m - 1) // m * m


def _loss_tile_kernel(s_ref, p_ref, n_ref, cs_ref, cp_ref, lab_ref, out_ref, *,
                      margin, cls_weight, tile_b, feat_d, pack):
    """One batch tile -> one scalar partial sum: hinge_sum + w*(ce_s + ce_p)."""
    s = s_ref[...].astype(jnp.float32)
    p = p_ref[...].astype(jnp.float32)
    n = n_ref[...].astype(jnp.float32)

    sq_ap = jnp.square(s - p + _PAIRWISE_EPS)
    sq_an = jnp.square(s - n + _PAIRWISE_EPS)

    if pack > 1:
        # s/p/n arrive lane-dense as (tile_b // pack, 128); recover per-row
        # sums of squares with a block-diagonal 0/1 matmul on the idle MXU.
        lanes = jax.lax.broadcasted_iota(jnp.int32, (128, pack), 0)
        segs = jax.lax.broadcasted_iota(jnp.int32, (128, pack), 1)
        seg_mat = (lanes // feat_d == segs).astype(jnp.float32)   # (128, pack)
        ss_ap = jnp.dot(sq_ap, seg_mat, preferred_element_type=jnp.float32)
        ss_an = jnp.dot(sq_an, seg_mat, preferred_element_type=jnp.float32)
    else:
        ss_ap = jnp.sum(sq_ap, axis=-1, keepdims=True)
        ss_an = jnp.sum(sq_an, axis=-1, keepdims=True)

    d_ap = jnp.sqrt(ss_ap)
    d_an = jnp.sqrt(ss_an)
    hinge_sum = jnp.sum(jnp.maximum(d_ap - d_an + margin, 0.0))

    # --- cross-entropy partial sums (one-hot hoisted, log-probs not built) ---
    labels = lab_ref[...]                                    # (tile_b, 1) int32
    num_classes = cs_ref.shape[-1]
    classes = jax.lax.broadcasted_iota(jnp.int32, (tile_b, num_classes), 1)
    onehot = (classes == labels).astype(jnp.float32)         # (tile_b, C)

    def ce_sum(logits):
        m = jnp.max(logits, axis=-1, keepdims=True)
        z = logits - m
        lse = jnp.log(jnp.sum(jnp.exp(z), axis=-1, keepdims=True))
        picked = jnp.sum(z * onehot, axis=-1, keepdims=True)
        return jnp.sum(lse - picked)

    ce_s = ce_sum(cs_ref[...].astype(jnp.float32))
    ce_p = ce_sum(cp_ref[...].astype(jnp.float32))

    partial = hinge_sum + cls_weight * (ce_s + ce_p)
    out_ref[...] = jnp.full(out_ref.shape, partial, dtype=jnp.float32)


def _tail_partial_sum(s, p, n, cs, cp, labels, margin, cls_weight):
    """Plain-JAX partial sum for the (< tile) batch tail (no padding copies)."""
    s, p, n = (x.astype(jnp.float32) for x in (s, p, n))
    d_ap = jnp.sqrt(jnp.sum(jnp.square(s - p + _PAIRWISE_EPS), axis=-1))
    d_an = jnp.sqrt(jnp.sum(jnp.square(s - n + _PAIRWISE_EPS), axis=-1))
    hinge = jnp.sum(jnp.maximum(d_ap - d_an + margin, 0.0))

    def ce_sum(logits):
        logits = logits.astype(jnp.float32)
        lse = jax.nn.logsumexp(logits, axis=-1)
        picked = jnp.take_along_axis(logits, labels[:, None], axis=-1)[:, 0]
        return jnp.sum(lse - picked)

    return hinge + cls_weight * (ce_sum(cs) + ce_sum(cp))


def triplet_margin_loss_with_classification(s_logits, p_logits, n_logits,
                                            cs_logits, cp_logits, labels, *,
                                            margin, classification_weight=0.5,
                                            max_tile_b=None):
    """Forward pass of TripletMarginLoss_with_classification. Returns a scalar."""
    b, d = s_logits.shape
    c = cs_logits.shape[-1]
    margin = float(margin)
    w = float(classification_weight)
    labels_col = labels.astype(jnp.int32).reshape(-1, 1)

    # --- generation-aware VMEM budget (v7x: 64 MiB; v5e/v6e: 128 MiB) --------
    try:
        vmem_cap = int(pltpu.get_tpu_info().vmem_capacity_bytes)
    except Exception:  # be conservative if the query is unavailable
        vmem_cap = 64 * 1024 * 1024
    if vmem_cap <= 64 * 1024 * 1024:
        per_buf_budget = 12 * 1024 * 1024
        vmem_limit_cap = 48 * 1024 * 1024
    else:
        per_buf_budget = 28 * 1024 * 1024
        vmem_limit_cap = 96 * 1024 * 1024

    # --- lane-packing decision for s/p/n (small feature dims) ----------------
    pack = 1
    if d < 128 and 128 % d == 0 and (b * d) % 128 == 0:
        pack = 128 // d
    if b < 8 * pack or (max_tile_b is not None and max_tile_b < 8 * pack):
        pack = 1  # not enough rows for an aligned lane-dense tile

    # --- dtype- and layout-aware per-row VMEM byte accounting ----------------
    spn_itemsize = jnp.dtype(s_logits.dtype).itemsize
    cls_itemsize = jnp.dtype(cs_logits.dtype).itemsize
    spn_row = (d if pack > 1 else _round_up(d, 128)) * spn_itemsize
    bytes_per_row = (3 * spn_row
                     + 2 * _round_up(c, 128) * cls_itemsize
                     + 128 * 4)  # int32 label column (lane-padded in VMEM)

    # --- batch tile size ------------------------------------------------------
    if b < 8:
        tb = b                                     # single full-batch block
        pack = 1
    else:
        row_align = 8 * pack
        tb_cap = max_tile_b if max_tile_b is not None else 8192
        tb = min(tb_cap, per_buf_budget // max(bytes_per_row, 1))
        tb = (tb // row_align) * row_align
        tb = min(max(tb, row_align), (b // row_align) * row_align)

    num_tiles = b // tb
    main_rows = num_tiles * tb
    tail = b - main_rows

    # --- kernel inputs / BlockSpecs -------------------------------------------
    if pack > 1:
        pk_rows = tb * d // 128
        s_in = s_logits.reshape(b * d // 128, 128)   # free logical reshape
        p_in = p_logits.reshape(b * d // 128, 128)
        n_in = n_logits.reshape(b * d // 128, 128)
        spn_spec = pl.BlockSpec((pk_rows, 128), lambda i: (i, 0))
    else:
        s_in, p_in, n_in = s_logits, p_logits, n_logits
        spn_spec = pl.BlockSpec((tb, d), lambda i: (i, 0))

    kernel = functools.partial(
        _loss_tile_kernel, margin=margin, cls_weight=w,
        tile_b=int(tb), feat_d=int(d), pack=int(pack))

    vmem_need = 2 * tb * bytes_per_row             # double-buffered input tiles
    vmem_limit = int(min(max(4 * vmem_need, 32 * 1024 * 1024), vmem_limit_cap))

    partials = pl.pallas_call(
        kernel,
        out_shape=jax.ShapeDtypeStruct((num_tiles, 1, 128), jnp.float32),
        grid=(num_tiles,),
        in_specs=[
            spn_spec, spn_spec, spn_spec,                      # s, p, n
            pl.BlockSpec((tb, c), lambda i: (i, 0)),           # cs
            pl.BlockSpec((tb, c), lambda i: (i, 0)),           # cp
            pl.BlockSpec((tb, 1), lambda i: (i, 0)),           # labels column
        ],
        out_specs=pl.BlockSpec((1, 1, 128), lambda i: (i, 0, 0)),
        compiler_params=pltpu.CompilerParams(
            dimension_semantics=("parallel",),                 # megacore on v7x
            vmem_limit_bytes=vmem_limit),
    )(s_in, p_in, n_in, cs_logits, cp_logits, labels_col)

    total = jnp.sum(partials[:, 0, 0])
    if tail:
        total = total + _tail_partial_sum(
            s_logits[main_rows:], p_logits[main_rows:], n_logits[main_rows:],
            cs_logits[main_rows:], cp_logits[main_rows:],
            labels.astype(jnp.int32)[main_rows:], margin, w)
    return total / jnp.float32(b)


# ------------------------------- testing -------------------------------------


def _reference(s, p, n, cs, cp, labels, margin, w):
    s, p, n, cs, cp = (x.astype(jnp.float32) for x in (s, p, n, cs, cp))
    d_ap = jnp.sqrt(jnp.sum(jnp.square(s - p + _PAIRWISE_EPS), axis=-1))
    d_an = jnp.sqrt(jnp.sum(jnp.square(s - n + _PAIRWISE_EPS), axis=-1))
    triplet = jnp.mean(jnp.maximum(d_ap - d_an + margin, 0.0))

    def ce(logits):
        lp = jax.nn.log_softmax(logits, axis=-1)
        return -jnp.mean(jnp.take_along_axis(lp, labels[:, None], axis=-1))

    return triplet + w * (ce(cs) + ce(cp))


def _run_case(key, b, d, c, margin, w, max_tile_b=None, dtype=jnp.float32):
    k1, k2, k3, k4, k5, k6 = jax.random.split(key, 6)
    s = jax.random.normal(k1, (b, d), dtype=jnp.float32).astype(dtype)
    p = jax.random.normal(k2, (b, d), dtype=jnp.float32).astype(dtype)
    n = jax.random.normal(k3, (b, d), dtype=jnp.float32).astype(dtype)
    cs = jax.random.normal(k4, (b, c), dtype=jnp.float32).astype(dtype)
    cp = jax.random.normal(k5, (b, c), dtype=jnp.float32).astype(dtype)
    labels = jax.random.randint(k6, (b,), 0, c, dtype=jnp.int32)

    loss = triplet_margin_loss_with_classification(
        s, p, n, cs, cp, labels, margin=margin, classification_weight=w,
        max_tile_b=max_tile_b)
    loss = jax.block_until_ready(loss)
    ref = _reference(s, p, n, cs, cp, labels, margin, w)
    tol = 1e-5 if dtype == jnp.float32 else 2e-3
    assert jnp.allclose(loss, ref, rtol=tol, atol=tol), (b, d, c, loss, ref)


if __name__ == "__main__":
    key = jax.random.PRNGKey(0)
    cases = [
        # Base case (matches module's small-shape usage): single tile, no tail.
        dict(b=8, d=32, c=16, margin=1.0, w=0.5),
        # Ragged batch, unpacked path: 8 rows in-kernel, 5-row tail in JAX.
        dict(b=13, d=32, c=16, margin=0.7, w=0.5),
        # Unpacked multi-tile grid (D not a divisor of 128), parallel partials.
        dict(b=48, d=40, c=24, margin=1.0, w=0.25, max_tile_b=16),
        # Lane-packed path (D=32 -> (B/4,128)), multi-tile, no tail.
        dict(b=256, d=32, c=16, margin=1.0, w=0.25, max_tile_b=64),
        # Lane-packed path with a ragged tail handled in JAX.
        dict(b=200, d=32, c=16, margin=0.5, w=0.5, max_tile_b=64),
        # bf16 inputs (dtype-aware tile sizing; math is f32 in-kernel).
        dict(b=64, d=128, c=40, margin=1.0, w=0.5, dtype=jnp.bfloat16),
    ]
    for cfg in cases:
        key, sub = jax.random.split(key)
        _run_case(sub, **cfg)
    print("KERNEL_OK")
</pallas_src>

<mosaic_0001>
module attributes {stable_mosaic.version = 11 : i64} {
  func.func @_loss_tile_kernel(%arg0: i32, %arg1: memref<8x32xf32, #tpu.memory_space<vmem>>, %arg2: memref<8x32xf32, #tpu.memory_space<vmem>>, %arg3: memref<8x32xf32, #tpu.memory_space<vmem>>, %arg4: memref<8x16xf32, #tpu.memory_space<vmem>>, %arg5: memref<8x16xf32, #tpu.memory_space<vmem>>, %arg6: memref<8x1xi32, #tpu.memory_space<vmem>>, %arg7: memref<1x1x128xf32, #tpu.memory_space<vmem>>) attributes {dimension_semantics = [#tpu.dimension_semantics<parallel>], iteration_bounds = array<i64: 1>, scalar_prefetch = 0 : i64, scratch_operands = 0 : i64, tpu.core_type = #tpu.core_type<tc>, window_params = [{transform_indices = @transform_0, window_bounds = array<i64: 8, 32>}, {transform_indices = @transform_1, window_bounds = array<i64: 8, 32>}, {transform_indices = @transform_2, window_bounds = array<i64: 8, 32>}, {transform_indices = @transform_3, window_bounds = array<i64: 8, 16>}, {transform_indices = @transform_4, window_bounds = array<i64: 8, 16>}, {transform_indices = @transform_5, window_bounds = array<i64: 8, 1>}, {transform_indices = @transform_6, window_bounds = array<i64: 1, 1, 128>}]} {
    %c0 = arith.constant 0 : index
    %c0_0 = arith.constant 0 : index
    %0 = vector.load %arg1[%c0, %c0_0] : memref<8x32xf32, #tpu.memory_space<vmem>>, vector<8x32xf32>
    %c0_1 = arith.constant 0 : index
    %c0_2 = arith.constant 0 : index
    %1 = vector.load %arg2[%c0_1, %c0_2] : memref<8x32xf32, #tpu.memory_space<vmem>>, vector<8x32xf32>
    %c0_3 = arith.constant 0 : index
    %c0_4 = arith.constant 0 : index
    %2 = vector.load %arg3[%c0_3, %c0_4] : memref<8x32xf32, #tpu.memory_space<vmem>>, vector<8x32xf32>
    %3 = arith.subf %0, %1 : vector<8x32xf32>
    %cst = arith.constant 9.99999997E-7 : f32
    %4 = vector.broadcast %cst : f32 to vector<8x32xf32>
    %5 = arith.addf %3, %4 : vector<8x32xf32>
    %6 = arith.mulf %5, %5 : vector<8x32xf32>
    %7 = arith.subf %0, %2 : vector<8x32xf32>
    %cst_5 = arith.constant 9.99999997E-7 : f32
    %8 = vector.broadcast %cst_5 : f32 to vector<8x32xf32>
    %9 = arith.addf %7, %8 : vector<8x32xf32>
    %10 = arith.mulf %9, %9 : vector<8x32xf32>
    %cst_6 = arith.constant dense<0.000000e+00> : vector<8xf32>
    %11 = vector.multi_reduction <add>, %6, %cst_6 [1] : vector<8x32xf32> to vector<8xf32>
    %12 = vector.shape_cast %11 : vector<8xf32> to vector<8x1xf32>
    %cst_7 = arith.constant dense<0.000000e+00> : vector<8xf32>
    %13 = vector.multi_reduction <add>, %10, %cst_7 [1] : vector<8x32xf32> to vector<8xf32>
    %14 = vector.shape_cast %13 : vector<8xf32> to vector<8x1xf32>
    %15 = math.sqrt %12 : vector<8x1xf32>
    %16 = math.sqrt %14 : vector<8x1xf32>
    %17 = arith.subf %15, %16 : vector<8x1xf32>
    %cst_8 = arith.constant 1.000000e+00 : f32
    %18 = vector.broadcast %cst_8 : f32 to vector<8x1xf32>
    %19 = arith.addf %17, %18 : vector<8x1xf32>
    %cst_9 = arith.constant 0.000000e+00 : f32
    %20 = vector.broadcast %cst_9 : f32 to vector<8x1xf32>
    %21 = arith.maximumf %19, %20 : vector<8x1xf32>
    %22 = vector.shape_cast %21 : vector<8x1xf32> to vector<1x8x1xf32>
    %cst_10 = arith.constant dense<0.000000e+00> : vector<1xf32>
    %23 = vector.multi_reduction <add>, %22, %cst_10 [1, 2] : vector<1x8x1xf32> to vector<1xf32>
    %24 = vector.shape_cast %23 : vector<1xf32> to vector<1x1x1xf32>
    %25 = vector.extract %24[0, 0, 0] : f32 from vector<1x1x1xf32>
    %c0_11 = arith.constant 0 : index
    %c0_12 = arith.constant 0 : index
    %26 = vector.load %arg6[%c0_11, %c0_12] : memref<8x1xi32, #tpu.memory_space<vmem>>, vector<8x1xi32>
    %27 = tpu.iota {dimensions = array<i32: 1>} : vector<8x16xi32>
    %28 = vector.broadcast %26 : vector<8x1xi32> to vector<8x16xi32>
    %29 = arith.cmpi eq, %27, %28 : vector<8x16xi32>
    %30 = arith.extui %29 : vector<8x16xi1> to vector<8x16xi32>
    %31 = arith.sitofp %30 : vector<8x16xi32> to vector<8x16xf32>
    %c0_13 = arith.constant 0 : index
    %c0_14 = arith.constant 0 : index
    %32 = vector.load %arg4[%c0_13, %c0_14] : memref<8x16xf32, #tpu.memory_space<vmem>>, vector<8x16xf32>
    %cst_15 = arith.constant dense<0xFF800000> : vector<8xf32>
    %33 = vector.multi_reduction <maximumf>, %32, %cst_15 [1] : vector<8x16xf32> to vector<8xf32>
    %34 = vector.shape_cast %33 : vector<8xf32> to vector<8x1xf32>
    %35 = vector.broadcast %34 : vector<8x1xf32> to vector<8x16xf32>
    %36 = arith.subf %32, %35 : vector<8x16xf32>
    %37 = math.exp %36 : vector<8x16xf32>
    %cst_16 = arith.constant dense<0.000000e+00> : vector<8xf32>
    %38 = vector.multi_reduction <add>, %37, %cst_16 [1] : vector<8x16xf32> to vector<8xf32>
    %39 = vector.shape_cast %38 : vector<8xf32> to vector<8x1xf32>
    %40 = math.log %39 : vector<8x1xf32>
    %41 = arith.mulf %36, %31 : vector<8x16xf32>
    %cst_17 = arith.constant dense<0.000000e+00> : vector<8xf32>
    %42 = vector.multi_reduction <add>, %41, %cst_17 [1] : vector<8x16xf32> to vector<8xf32>
    %43 = vector.shape_cast %42 : vector<8xf32> to vector<8x1xf32>
    %44 = arith.subf %40, %43 : vector<8x1xf32>
    %45 = vector.shape_cast %44 : vector<8x1xf32> to vector<1x8x1xf32>
    %cst_18 = arith.constant dense<0.000000e+00> : vector<1xf32>
    %46 = vector.multi_reduction <add>, %45, %cst_18 [1, 2] : vector<1x8x1xf32> to vector<1xf32>
    %47 = vector.shape_cast %46 : vector<1xf32> to vector<1x1x1xf32>
    %48 = vector.extract %47[0, 0, 0] : f32 from vector<1x1x1xf32>
    %c0_19 = arith.constant 0 : index
    %c0_20 = arith.constant 0 : index
    %49 = vector.load %arg5[%c0_19, %c0_20] : memref<8x16xf32, #tpu.memory_space<vmem>>, vector<8x16xf32>
    %cst_21 = arith.constant dense<0xFF800000> : vector<8xf32>
    %50 = vector.multi_reduction <maximumf>, %49, %cst_21 [1] : vector<8x16xf32> to vector<8xf32>
    %51 = vector.shape_cast %50 : vector<8xf32> to vector<8x1xf32>
    %52 = vector.broadcast %51 : vector<8x1xf32> to vector<8x16xf32>
    %53 = arith.subf %49, %52 : vector<8x16xf32>
    %54 = math.exp %53 : vector<8x16xf32>
    %cst_22 = arith.constant dense<0.000000e+00> : vector<8xf32>
    %55 = vector.multi_reduction <add>, %54, %cst_22 [1] : vector<8x16xf32> to vector<8xf32>
    %56 = vector.shape_cast %55 : vector<8xf32> to vector<8x1xf32>
    %57 = math.log %56 : vector<8x1xf32>
    %58 = arith.mulf %53, %31 : vector<8x16xf32>
    %cst_23 = arith.constant dense<0.000000e+00> : vector<8xf32>
    %59 = vector.multi_reduction <add>, %58, %cst_23 [1] : vector<8x16xf32> to vector<8xf32>
    %60 = vector.shape_cast %59 : vector<8xf32> to vector<8x1xf32>
    %61 = arith.subf %57, %60 : vector<8x1xf32>
    %62 = vector.shape_cast %61 : vector<8x1xf32> to vector<1x8x1xf32>
    %cst_24 = arith.constant dense<0.000000e+00> : vector<1xf32>
    %63 = vector.multi_reduction <add>, %62, %cst_24 [1, 2] : vector<1x8x1xf32> to vector<1xf32>
    %64 = vector.shape_cast %63 : vector<1xf32> to vector<1x1x1xf32>
    %65 = vector.extract %64[0, 0, 0] : f32 from vector<1x1x1xf32>
    %66 = arith.addf %48, %65 : f32
    %cst_25 = arith.constant 5.000000e-01 : f32
    %67 = arith.mulf %cst_25, %66 : f32
    %68 = arith.addf %25, %67 : f32
    %69 = vector.broadcast %68 : f32 to vector<1x1x128xf32>
    %c0_26 = arith.constant 0 : index
    %c0_27 = arith.constant 0 : index
    %c0_28 = arith.constant 0 : index
    %70 = vector.load %arg7[%c0_26, %c0_27, %c0_28] : memref<1x1x128xf32, #tpu.memory_space<vmem>>, vector<1x1x128xf32>
    tpu.vector_store %arg7[%c0_26, %c0_27, %c0_28], %69 {strides = array<i32>} : memref<1x1x128xf32, #tpu.memory_space<vmem>>, vector<1x1x128xf32>,
    return
  }
  func.func @transform_0(%arg0: i32) -> (i32, i32) {
    %c0_i32 = arith.constant 0 : i32
    %c0_i32_0 = arith.constant 0 : i32
    return %arg0, %c0_i32 : i32, i32
  }
  func.func @transform_1(%arg0: i32) -> (i32, i32) {
    %c0_i32 = arith.constant 0 : i32
    %c0_i32_0 = arith.constant 0 : i32
    return %arg0, %c0_i32 : i32, i32
  }
  func.func @transform_2(%arg0: i32) -> (i32, i32) {
    %c0_i32 = arith.constant 0 : i32
    %c0_i32_0 = arith.constant 0 : i32
    return %arg0, %c0_i32 : i32, i32
  }
  func.func @transform_3(%arg0: i32) -> (i32, i32) {
    %c0_i32 = arith.constant 0 : i32
    %c0_i32_0 = arith.constant 0 : i32
    return %arg0, %c0_i32 : i32, i32
  }
  func.func @transform_4(%arg0: i32) -> (i32, i32) {
    %c0_i32 = arith.constant 0 : i32
    %c0_i32_0 = arith.constant 0 : i32
    return %arg0, %c0_i32 : i32, i32
  }
  func.func @transform_5(%arg0: i32) -> (i32, i32) {
    %c0_i32 = arith.constant 0 : i32
    %c0_i32_0 = arith.constant 0 : i32
    return %arg0, %c0_i32 : i32, i32
  }
  func.func @transform_6(%arg0: i32) -> (i32, i32, i32) {
    %c0_i32 = arith.constant 0 : i32
    %c0_i32_0 = arith.constant 0 : i32
    %c0_i32_1 = arith.constant 0 : i32
    return %arg0, %c0_i32, %c0_i32_0 : i32, i32, i32
  }
}

</mosaic_0001>

<bundles_post_ra>
// kernel: tpu_custom_call.1
= control target key start
LH: loop header
LB: loop body
LE: loop exit
PB: predicated region body
PF: predicated region fallthrough
CT: control target
= control target key end

     0   :  { %11 = vsyncpa [#allocation3], 0  ;;  %s372_s0 = inlined_call_operand.vmem [shape: f32[8,32], index: 0, kind: input, shape index: {}]   ;;  %s373_s1 = inlined_call_operand.hbm [shape: f32[8,32], index: 1, kind: input, shape index: {}]   ;;  %s374_s2 = inlined_call_operand.vmem [shape: f32[8,32], index: 2, kind: input, shape index: {}]   ;;  %s375_s3 = inlined_call_operand.hbm [shape: f32[8,16], index: 3, kind: input, shape index: {}]   ;;  %s376_s4 = inlined_call_operand.vmem [shape: f32[8,16], index: 4, kind: input, shape index: {}]   ;;  %s377_s5 = inlined_call_operand.vmem [shape: s32[8,1], index: 5, kind: input, shape index: {}]   ;;  %s378_s6 = inlined_call_operand.hbm [shape: f32[1,1,128], index: 6, kind: output, shape index: {}]  }
   0x1   :  { %12 = vsyncpa [#allocation6], 0 }
   0x2   :  { %13 = vsyncpa [#allocation4], 0  ;;  %s275_s21 = smov [#allocation2]   ;;  %s276_s23 = smov [#allocation5]  }
   0x3   :  { %s22_s22 = sshll.u32 %s275_s21, 4  ;;  %s34_s24 = sshll.u32 %s276_s23, 4  ;;  %s23_s22 = int_to_ptr.vmem [resolvable:$true] %s22_s22  ;;  %s35_s24 = int_to_ptr.vmem [resolvable:$true] %s34_s24 }
   0x4   :  { %s203_s27 = scalar_lea.hbm %s373_s1, 128 }
   0x5   :  { %p204_p0 = scmp.ne.s32.totalorder %s373_s1, %s203_s27  ;;  %p207_p1 = scmp.lt.u32.totalorder %s203_s27, %s373_s1 }
   0x7   :  { %p209_p2 = pnand %p207_p1, %p204_p0 }
   0x9   :  { %212 = shalt.err (!%p209_p2)
}
   0xa   :  { %s213_s8 = scalar_lea.vmem %s23_s22, 128  ;;  %p218_p4 = scmp.lt.s32.totalorder %s23_s22, %s23_s22 }
   0xb   :  { %p214_p3 = scmp.ne.s32.totalorder %s23_s22, %s213_s8  ;;  %p219_p5 = scmp.lt.s32.totalorder %s213_s8, %s213_s8 }
   0xd   :  { %p220_p6 = por %p219_p5, %p218_p4 }
   0xf   :  { %p221_p7 = pnand %p220_p6, %p214_p3 }
  0x11   :  { %224 = shalt.err (!%p221_p7)
}
  0x12   :  { %25 = dma.hbm_to_vmem [thread:$0]  %s373_s1, 128, %s23_s22, [#allocation3]  }
  0x13   :  { %s225_s13 = scalar_lea.hbm %s375_s3, 128 }
  0x14   :  { %p226_p8 = scmp.ne.s32.totalorder %s375_s3, %s225_s13  ;;  %p229_p9 = scmp.lt.u32.totalorder %s225_s13, %s375_s3 }
  0x16   :  { %p231_p10 = pnand %p229_p9, %p226_p8 }
  0x18   :  { %234 = shalt.err (!%p231_p10)
}
  0x19   :  { %s235_s18 = scalar_lea.vmem %s35_s24, 128  ;;  %p240_p12 = scmp.lt.s32.totalorder %s35_s24, %s35_s24 }
  0x1a   :  { %p236_p11 = scmp.ne.s32.totalorder %s35_s24, %s235_s18  ;;  %p241_p13 = scmp.lt.s32.totalorder %s235_s18, %s235_s18 }
  0x1c   :  { %p242_p0 = por %p241_p13, %p240_p12 }
  0x1e   :  { %p243_p1 = pnand %p242_p0, %p236_p11 }
  0x20   :  { %246 = shalt.err (!%p243_p1)
}
  0x21   :  { %37 = dma.hbm_to_vmem [thread:$0]  %s375_s3, 128, %s35_s24, [#allocation6]  }
  0x22   :  { %269 = dma.done.wait [#allocation3], 128  }
  0x23   :  { %270 = vsyncadd [#allocation3], 4294967168 }
  0x24   :  { %271 = dma.done.wait [#allocation6], 128  }
  0x25   :  { %272 = vsyncadd [#allocation6], 4294967168  ;;  %v277_v0 = vmov 0   ;;  %vm102_vm0 = vcmask 130048   ;;  %v101_v1 = vld [vmem:[#allocation5] sm:$0xff]  ;;  %v129_v2 = vld [vmem:[%s376_s4] sm:$0xff]  ;;  %v93_v22 = vlaneseq }
  0x26   :  { %189 = vset.pattern.permute.xlu1 %v277_v0  ;;  %190 = vset.pattern.permute.xlu0 %v277_v0  ;;  %v92_v3 = vld [vmem:[%s377_s5] sm:$0xff]  ;;  %v103_v4 = vsel %vm102_vm0, %v101_v1, -inf  ;;  %v130_v8 = vsel %vm102_vm0, %v129_v2, -inf  ;;  %vm57_vm1 = vcmask 261120   ;;  %v278_v28 = vmov 0.0   ;;  %s279_s28 = smov [#allocation7]  }
  0x27   :  { %96 = vperm.xlu1 %189, %v92_v3   ;;  %v48_v5 = vld [vmem:[%s372_s0] sm:$0xff]  ;;  %104 = vmax.xlane.f32.xlu0 %v103_v4  ;;  %v94_v24 = vand.u32 127, %v93_v22  ;;  %vm81_vm7 = vcmask 7168   ;;  %s167_s29 = sshll.u32 %s279_s28, 4  ;;  %s168_s29 = int_to_ptr.vmem [resolvable:$true] %s167_s29 }
  0x28   :  { %v50_v6 = vld [vmem:[%s374_s2] sm:$0xff]  ;;  %s247_s7 = scalar_lea.vmem %s168_s29, 16  ;;  %s251_s8 = scalar_lea.vmem %s168_s29, 32 }
  0x29   :  { %v54_v7 = vsub.f32 %v48_v5, %v50_v6  ;;  %v49_v12 = vld [vmem:[#allocation2] sm:$0xff]  ;;  %p248_p2 = scmp.ne.s32.totalorder %s168_s29, %s247_s7  ;;  %p252_p3 = scmp.lt.s32.totalorder %s168_s29, %s168_s29 }
  0x2a   :  { %v51_v13 = vsub.f32 %v48_v5, %v49_v12  ;;  %p253_p4 = scmp.lt.s32.totalorder %s251_s8, %s247_s7 }
  0x2b   :  { %v55_v9 = vadd.f32 1e-06, %v54_v7  ;;  %131 = vmax.xlane.f32.xlu0 %v130_v8 }
  0x2c   :  { %v52_v14 = vadd.f32 1e-06, %v51_v13  ;;  %p254_p5 = por %p253_p4, %p252_p3 }
  0x2d   :  { %v56_v10 = vmul.f32 %v55_v9, %v55_v9 }
  0x2e   :  { %v53_v15 = vmul.f32 %v52_v14, %v52_v14  ;;  %p255_p6 = pnand %p254_p5, %p248_p2 }
  0x2f   :  { %v61_v11 = vsel %vm57_vm1, %v56_v10, 0.0 }
  0x30   :  { %62 = vadd.xlane.f32.xlu0 %v61_v11  ;;  %v58_v16 = vsel %vm57_vm1, %v53_v15, 0.0 }
  0x4b   :  { %59 = vadd.xlane.f32.xlu1 %v58_v16 }
  0xa6   :  { %v97_v25 = vpop.permute.xlu1 %96 }
  0xa7   :  { %vm98_vm2 = vcmp.eq.s32.totalorder %v94_v24, %v97_v25 }
  0xa8   :  { %v177_v29 = vsel %vm98_vm2, 1.0, %v278_v28 }
  0xb4   :  { %v105_v17 = vpop.xlane.xlu0 %104 }
  0xb5   :  { %v106_v18 = vsub.f32 %v101_v1, %v105_v17 }
  0xb7   :  { %v107_v19 = vmul.f32 1.442695, %v106_v18  ;;  %v114_v32 = vmul.f32 %v177_v29, %v106_v18 }
  0xb8   :  { %v132_v20 = vpop.xlane.xlu0 %131 }
  0xb9   :  { %191 = vpow2.f32 %v107_v19  ;;  %v133_v21 = vsub.f32 %v129_v2, %v132_v20  ;;  %v115_v33 = vsel %vm102_vm0, %v114_v32, 0.0 }
  0xbb   :  { %v134_v23 = vmul.f32 1.442695, %v133_v21  ;;  %v141_v34 = vmul.f32 %v177_v29, %v133_v21 }
  0xbd   :  { %193 = vpow2.f32 %v134_v23  ;;  %v63_v35 = vpop.xlane.xlu0 %62  ;;  %v142_v36 = vsel %vm102_vm0, %v141_v34, 0.0 }
  0xbe   :  { %195 = vrsqrt.f32 %v63_v35  ;;  %vm73_vm3 = vcmp.eq.f32.partialorder %v63_v35, inf  ;;  %v76_v40 = vand.u32 2147483648, %v63_v35  ;;  %vm75_vm4 = vcmp.eq.f32.partialorder %v63_v35, 0.0 }
  0xc3   :  { %v192_v26 = vpop.eup %191 }
  0xc4   :  { %v109_v27 = vsel %vm102_vm0, %v192_v26, 0.0 }
  0xc5   :  { %110 = vadd.xlane.f32.xlu0 %v109_v27 }
  0xc7   :  { %v194_v30 = vpop.eup %193 }
  0xc8   :  { %v136_v31 = vsel %vm102_vm0, %v194_v30, 0.0  ;;  %v196_v38 = vpop.eup %195 }
  0xc9   :  { %137 = vadd.xlane.f32.xlu0 %v136_v31  ;;  %v72_v39 = vmul.f32 %v196_v38, %v63_v35 }
  0xcb   :  { %v74_v41 = vsel %vm73_vm3, %v63_v35, %v72_v39 }
  0xcc   :  { %v77_v45 = vsel %vm75_vm4, %v76_v40, %v74_v41 }
  0xcd   :  { %116 = vadd.xlane.f32.xlu0 %v115_v33 }
  0xd1   :  { %143 = vadd.xlane.f32.xlu0 %v142_v36 }
  0xd8   :  { %v60_v37 = vpop.xlane.xlu1 %59 }
  0xd9   :  { %197 = vrsqrt.f32 %v60_v37  ;;  %vm66_vm5 = vcmp.eq.f32.partialorder %v60_v37, inf  ;;  %v69_v43 = vand.u32 2147483648, %v60_v37  ;;  %vm68_vm6 = vcmp.eq.f32.partialorder %v60_v37, 0.0 }
  0xe3   :  { %v198_v42 = vpop.eup %197 }
  0xe4   :  { %v65_v44 = vmul.f32 %v198_v42, %v60_v37 }
  0xe6   :  { %v67_v46 = vsel %vm66_vm5, %v60_v37, %v65_v44 }
  0xe7   :  { %v70_v47 = vsel %vm68_vm6, %v69_v43, %v67_v46 }
  0xe8   :  { %v78_v48 = vsub.f32 %v70_v47, %v77_v45 }
  0xea   :  { %v79_v49 = vadd.f32 1.0, %v78_v48 }
  0xec   :  { %v80_v50 = vmax.f32 %v79_v49, 0.0 }
  0xee   :  { %v82_v51 = vsel %vm81_vm7, %v80_v50, 0.0 }
  0xef   :  { %83 = vadd.xlane.f32.xlu0 %v82_v51 }
 0x152   :  { %v111_v52 = vpop.xlane.xlu0 %110 }
 0x153   :  { %199 = vlog2.f32 %v111_v52 }
 0x156   :  { %v138_v53 = vpop.xlane.xlu0 %137 }
 0x157   :  { %201 = vlog2.f32 %v138_v53 }
 0x15a   :  { %v117_v55 = vpop.xlane.xlu0 %116 }
 0x15d   :  { %v200_v54 = vpop.eup %199 }
 0x15e   :  { %v113_v56 = vmul.f32 0.6931472, %v200_v54  ;;  %v144_v61 = vpop.xlane.xlu0 %143 }
 0x160   :  { %v118_v57 = vsub.f32 %v113_v56, %v117_v55 }
 0x161   :  { %v202_v58 = vpop.eup %201 }
 0x162   :  { %v140_v59 = vmul.f32 0.6931472, %v202_v58  ;;  %v119_v60 = vsel %vm81_vm7, %v118_v57, 0.0 }
 0x163   :  { %120 = vadd.xlane.f32.xlu0 %v119_v60 }
 0x164   :  { %v145_v62 = vsub.f32 %v140_v59, %v144_v61 }
 0x166   :  { %v146_v63 = vsel %vm81_vm7, %v145_v62, 0.0 }
 0x167   :  { %147 = vadd.xlane.f32.xlu0 %v146_v63 }
 0x17c   :  { %v84_v0 = vpop.xlane.xlu0 %83 }
 0x17d   :  { %v85_v1 = vrot.slane %v84_v0, 4 }
 0x17f   :  { %v86_v2 = vadd.f32 %v85_v1, %v84_v0 }
 0x181   :  { %v87_v3 = vrot.slane %v86_v2, 2 }
 0x183   :  { %v88_v4 = vadd.f32 %v87_v3, %v86_v2 }
 0x185   :  { %v89_v5 = vrot.slane %v88_v4, 1 }
 0x187   :  { %v90_v6 = vadd.f32 %v89_v5, %v88_v4 }
 0x189   :  { %178 = vpush %v90_v6 }
 0x1ba   :  { %s179_s0 = spop %178 }
 0x1f0   :  { %v121_v7 = vpop.xlane.xlu0 %120 }
 0x1f1   :  { %v122_v8 = vrot.slane %v121_v7, 4 }
 0x1f3   :  { %v123_v9 = vadd.f32 %v122_v8, %v121_v7 }
 0x1f4   :  { %v148_v10 = vpop.xlane.xlu0 %147 }
 0x1f5   :  { %v124_v11 = vrot.slane %v123_v9, 2  ;;  %v149_v12 = vrot.slane %v148_v10, 4 }
 0x1f7   :  { %v150_v13 = vadd.f32 %v149_v12, %v148_v10  ;;  %v125_v14 = vadd.f32 %v124_v11, %v123_v9 }
 0x1f9   :  { %v151_v15 = vrot.slane %v150_v13, 2  ;;  %v126_v16 = vrot.slane %v125_v14, 1 }
 0x1fb   :  { %v152_v17 = vadd.f32 %v151_v15, %v150_v13  ;;  %v127_v18 = vadd.f32 %v126_v16, %v125_v14 }
 0x1fd   :  { %180 = vpush %v127_v18  ;;  %v153_v19 = vrot.slane %v152_v17, 1 }
 0x1ff   :  { %v154_v20 = vadd.f32 %v153_v19, %v152_v17 }
 0x201   :  { %182 = vpush %v154_v20 }
 0x22e   :  { %s181_s2 = spop %180 }
 0x232   :  { %s183_s4 = spop %182 }
 0x233   :  { %s156_s5 = sadd.f32 %s183_s4, %s181_s2 }
 0x235   :  { %s157_s27 = smul.f32 0.5, %s156_s5 }
 0x237   :  { %s158_s30 = sadd.f32 %s179_s0, %s157_s27 }
 0x239   :  { %v159_v21 = vstv %s158_s30 }
 0x23a   :  { %160 = vst [vmem:[#allocation7] sm:$0x1] %v159_v21 }
 0x23b   :  { %258 = shalt.err (!%p255_p6)
}
 0x23c   :  { %s259_s11 = scalar_lea.hbm %s378_s6, 16 }
 0x23d   :  { %p260_p7 = scmp.ne.s32.totalorder %s378_s6, %s259_s11  ;;  %p263_p8 = scmp.lt.u32.totalorder %s259_s11, %s378_s6 }
 0x23f   :  { %p265_p9 = pnand %p263_p8, %p260_p7 }
 0x241   :  { %268 = shalt.err (!%p265_p9)
}
 0x242   :  { %170 = dma.vmem_to_hbm [thread:$0]  %s168_s29, 16, %s378_s6, [#allocation4]  }
 0x243   :  { %273 = dma.done.wait [#allocation4], 16  }
 0x244   :  { %274 = vsyncadd [#allocation4], 4294967280 }
 0x245   :  { %174 = vsyncpa [#allocation3], 1 }
 0x246   :  { %175 = vsyncpa [#allocation6], 1 }
 0x247   :  { %176 = vsyncpa [#allocation4], 1 }

</bundles_post_ra>
